<compile_context>
chip_gen: v5e
topology: v5e:2x2
jax: 0.10.0
libtpu: 0.0.40
codegen_flags: <defaults>
</compile_context>

<pallas_src>
import functools
import math

import jax
import jax.numpy as jnp
from jax.experimental import pallas as pl
from jax.experimental.pallas import tpu as pltpu

D_MODEL = 512
D_HIDDEN = 32


def adapter_kernel(x_ref, wd_ref, bd_ref, wu_ref, bu_ref, o_ref, *, skip_connect):
    # x_ref: (tm, 512), wd_ref: (512, 32), bd_ref: (1, 32)
    # wu_ref: (32, 512), bu_ref: (1, 512), o_ref: (tm, 512)
    h = jnp.dot(x_ref[...], wd_ref[...], preferred_element_type=jnp.float32)
    h = jnp.maximum(h + bd_ref[...], 0.0)                       # bias + ReLU (f32)
    y = jnp.dot(h.astype(wu_ref.dtype), wu_ref[...],
                preferred_element_type=jnp.float32)
    y = y + bu_ref[...]
    if skip_connect:
        # Re-read the input tile here (static branch) instead of keeping a
        # full (tm, 512) f32 temporary live across both matmuls.
        y = y + x_ref[...].astype(jnp.float32)
    o_ref[...] = y.astype(o_ref.dtype)


def clip_adapter_forward(x, w_down, b_down, w_up, b_up, *,
                         skip_connect=False, tm=1024, stream_dtype=None):
    """x: (..., 512). Weights stored PyTorch-style: w_down (32,512), w_up (512,32).

    stream_dtype: dtype used for the streamed slab and weights (defaults to
    x.dtype).  Pass jnp.bfloat16 for ~2x less HBM traffic; the output is
    emitted in that dtype.  Accumulation is always f32.
    """
    orig_shape = x.shape
    assert orig_shape[-1] == D_MODEL
    sdt = jnp.dtype(stream_dtype) if stream_dtype is not None else jnp.dtype(x.dtype)
    x2d = x.reshape(-1, D_MODEL).astype(sdt)
    rows = x2d.shape[0]

    itemsize = sdt.itemsize
    # Native sublane tiling: (8,128) for 32-bit, (16,128) for bf16/fp16.
    sub = 8 if itemsize >= 4 else 16

    # Pad rows only up to the sublane multiple, then split into near-equal
    # sublane-aligned tiles (no padding to a full tm multiple).
    rows_sub = max(sub, ((rows + sub - 1) // sub) * sub)
    tm_max = max(sub, (int(tm) // sub) * sub)
    # Keep both v7x TensorCores busy: >= 2 grid steps whenever possible.
    min_steps = 2 if rows_sub >= 2 * sub else 1
    n_steps = max(pl.cdiv(rows_sub, tm_max), min_steps)
    tm = ((pl.cdiv(rows_sub, n_steps) + sub - 1) // sub) * sub
    rows_padded = n_steps * tm
    if rows_padded != rows:
        x2d = jnp.pad(x2d, ((0, rows_padded - rows), (0, 0)))

    # Pre-transpose weights to (in, out) so the kernel does x @ W on the MXU.
    # Weights follow the streamed dtype; biases stay f32 (folded into the f32
    # accumulators).
    wd_t = w_down.T.astype(sdt)                       # (512, 32)
    wu_t = w_up.T.astype(sdt)                         # (32, 512)
    bd2 = b_down.reshape(1, D_HIDDEN).astype(jnp.float32)
    bu2 = b_up.reshape(1, D_MODEL).astype(jnp.float32)

    grid = (n_steps,)

    bytes_x = rows_padded * D_MODEL * itemsize
    bytes_w = (wd_t.size + wu_t.size) * itemsize + (bd2.size + bu2.size) * 4
    cost = pl.CostEstimate(
        flops=2 * rows_padded * D_MODEL * D_HIDDEN * 2,   # down + up matmuls
        transcendentals=0,
        bytes_accessed=2 * bytes_x + bytes_w,             # read x, write y, weights
    )

    # Block buffers: double-buffered x and out tiles, plus f32 temporaries.
    # Only pass an explicit VMEM limit when the working set exceeds the 32 MiB
    # scoped default (i.e. a caller asked for tm=2048 f32 on v6e/v7x); the
    # tm=1024 default stays within every generation's default, incl. v5e.
    vmem_need = 4 * tm * D_MODEL * itemsize + tm * D_MODEL * 4 + (1 << 20)
    vmem_limit = int(min(vmem_need, 56 << 20)) if vmem_need > (32 << 20) else None

    kernel = functools.partial(adapter_kernel, skip_connect=skip_connect)

    out = pl.pallas_call(
        kernel,
        out_shape=jax.ShapeDtypeStruct((rows_padded, D_MODEL), sdt),
        grid_spec=pl.GridSpec(
            grid=grid,
            in_specs=[
                pl.BlockSpec((tm, D_MODEL), lambda i: (i, 0)),        # x tile
                pl.BlockSpec((D_MODEL, D_HIDDEN), lambda i: (0, 0)),  # W_down^T (resident)
                pl.BlockSpec((1, D_HIDDEN), lambda i: (0, 0)),        # b_down
                pl.BlockSpec((D_HIDDEN, D_MODEL), lambda i: (0, 0)),  # W_up^T   (resident)
                pl.BlockSpec((1, D_MODEL), lambda i: (0, 0)),         # b_up
            ],
            out_specs=pl.BlockSpec((tm, D_MODEL), lambda i: (i, 0)),
        ),
        compiler_params=pltpu.CompilerParams(
            dimension_semantics=("parallel",),
            vmem_limit_bytes=vmem_limit,
        ),
        cost_estimate=cost,
    )(x2d, wd_t, bd2, wu_t, bu2)

    if rows_padded != rows:
        out = out[:rows]
    return out.reshape(orig_shape)


def init_params(key):
    """Deterministic init mirroring the PyTorch __init__."""
    # down.weight: kaiming_uniform_(a=sqrt(5)) on shape (32, 512)
    fan_in = D_MODEL
    a = math.sqrt(5.0)
    gain = math.sqrt(2.0 / (1.0 + a * a))
    bound = gain * math.sqrt(3.0 / fan_in)
    w_down = jax.random.uniform(
        key, (D_HIDDEN, D_MODEL), dtype=jnp.float32, minval=-bound, maxval=bound
    )
    b_down = jnp.zeros((D_HIDDEN,), jnp.float32)
    w_up = jnp.zeros((D_MODEL, D_HIDDEN), jnp.float32)   # zero-init as in module
    b_up = jnp.zeros((D_MODEL,), jnp.float32)
    return w_down, b_down, w_up, b_up


def reference_forward(x, w_down, b_down, w_up, b_up, skip_connect=False):
    h = jnp.maximum(x @ w_down.T + b_down, 0.0)
    y = h @ w_up.T + b_up
    return y + x if skip_connect else y


if __name__ == "__main__":
    key = jax.random.PRNGKey(0)
    k_w, k_x, k_wd, k_bd, k_wu, k_bu = jax.random.split(key, 6)

    # --- 1) Exact module init (w_up/b_up zero), f32 bit-parity path ---
    w_down, b_down, w_up, b_up = init_params(k_w)
    x = jax.random.normal(k_x, (2, 8, D_MODEL), dtype=jnp.float32)

    y = clip_adapter_forward(x, w_down, b_down, w_up, b_up, skip_connect=False)
    y = jax.block_until_ready(y)
    y_ref = reference_forward(x, w_down, b_down, w_up, b_up, skip_connect=False)
    assert y.shape == x.shape
    assert jnp.allclose(y, y_ref, atol=1e-5, rtol=1e-5)

    # --- 2) Random weights: up-projection, fused skip path, and the
    #        ragged-rows path (3*7 = 21 rows -> 2 grid steps of 16 rows) ---
    w_down_r = jax.random.normal(k_wd, (D_HIDDEN, D_MODEL), jnp.float32) * 0.05
    b_down_r = jax.random.normal(k_bd, (D_HIDDEN,), jnp.float32) * 0.05
    w_up_r = jax.random.normal(k_wu, (D_MODEL, D_HIDDEN), jnp.float32) * 0.05
    b_up_r = jax.random.normal(k_bu, (D_MODEL,), jnp.float32) * 0.05
    x2 = jax.random.normal(k_x, (3, 7, D_MODEL), dtype=jnp.float32)

    y2 = clip_adapter_forward(x2, w_down_r, b_down_r, w_up_r, b_up_r,
                              skip_connect=True)
    y2 = jax.block_until_ready(y2)
    y2_ref = reference_forward(x2, w_down_r, b_down_r, w_up_r, b_up_r,
                               skip_connect=True)
    assert y2.shape == x2.shape
    assert jnp.allclose(y2, y2_ref, atol=1e-4, rtol=1e-4)

    # --- 3) bf16 streaming path (halved HBM traffic), loose tolerance vs a
    #        bf16-cast f32 reference ---
    y3 = clip_adapter_forward(x2, w_down_r, b_down_r, w_up_r, b_up_r,
                              skip_connect=False, stream_dtype=jnp.bfloat16)
    y3 = jax.block_until_ready(y3)
    assert y3.dtype == jnp.bfloat16 and y3.shape == x2.shape
    cast = lambda a: a.astype(jnp.bfloat16).astype(jnp.float32)
    y3_ref = reference_forward(cast(x2), cast(w_down_r), b_down_r,
                               cast(w_up_r), b_up_r, skip_connect=False)
    assert jnp.allclose(y3.astype(jnp.float32), y3_ref, atol=5e-2, rtol=5e-2)

    print("KERNEL_OK")
</pallas_src>

<mosaic_0001>
module attributes {stable_mosaic.version = 11 : i64} {
  func.func @adapter_kernel(%arg0: i32, %arg1: memref<8x512xf32, #tpu.memory_space<vmem>>, %arg2: memref<512x32xf32, #tpu.memory_space<vmem>>, %arg3: memref<1x32xf32, #tpu.memory_space<vmem>>, %arg4: memref<32x512xf32, #tpu.memory_space<vmem>>, %arg5: memref<1x512xf32, #tpu.memory_space<vmem>>, %arg6: memref<8x512xf32, #tpu.memory_space<vmem>>) attributes {dimension_semantics = [#tpu.dimension_semantics<parallel>], iteration_bounds = array<i64: 2>, scalar_prefetch = 0 : i64, scratch_operands = 0 : i64, tpu.core_type = #tpu.core_type<tc>, window_params = [{transform_indices = @transform_0, window_bounds = array<i64: 8, 512>}, {pipeline_mode = #tpu.pipeline_mode<synchronous>, transform_indices = @transform_1, window_bounds = array<i64: 512, 32>}, {pipeline_mode = #tpu.pipeline_mode<synchronous>, transform_indices = @transform_2, window_bounds = array<i64: 1, 32>}, {pipeline_mode = #tpu.pipeline_mode<synchronous>, transform_indices = @transform_3, window_bounds = array<i64: 32, 512>}, {pipeline_mode = #tpu.pipeline_mode<synchronous>, transform_indices = @transform_4, window_bounds = array<i64: 1, 512>}, {transform_indices = @transform_5, window_bounds = array<i64: 8, 512>}]} {
    %c0 = arith.constant 0 : index
    %c0_0 = arith.constant 0 : index
    %0 = vector.load %arg1[%c0, %c0_0] : memref<8x512xf32, #tpu.memory_space<vmem>>, vector<8x512xf32>
    %c0_1 = arith.constant 0 : index
    %c0_2 = arith.constant 0 : index
    %1 = vector.load %arg2[%c0_1, %c0_2] : memref<512x32xf32, #tpu.memory_space<vmem>>, vector<512x32xf32>
    %cst = arith.constant dense<0.000000e+00> : vector<8x32xf32>
    %2 = tpu.matmul %0, %1, %cst {dimension_numbers = #tpu.dot_dimension_numbers<[1], [0], [0], [1], [0, 0, 1, 1], [], []>} : vector<8x512xf32>, vector<512x32xf32>, vector<8x32xf32> -> vector<8x32xf32>
    %c0_3 = arith.constant 0 : index
    %c0_4 = arith.constant 0 : index
    %3 = vector.load %arg3[%c0_3, %c0_4] : memref<1x32xf32, #tpu.memory_space<vmem>>, vector<1x32xf32>
    %4 = vector.broadcast %3 : vector<1x32xf32> to vector<8x32xf32>
    %5 = arith.addf %2, %4 : vector<8x32xf32>
    %cst_5 = arith.constant 0.000000e+00 : f32
    %6 = vector.broadcast %cst_5 : f32 to vector<8x32xf32>
    %7 = arith.maximumf %5, %6 : vector<8x32xf32>
    %c0_6 = arith.constant 0 : index
    %c0_7 = arith.constant 0 : index
    %8 = vector.load %arg4[%c0_6, %c0_7] : memref<32x512xf32, #tpu.memory_space<vmem>>, vector<32x512xf32>
    %cst_8 = arith.constant dense<0.000000e+00> : vector<8x512xf32>
    %9 = tpu.matmul %7, %8, %cst_8 {dimension_numbers = #tpu.dot_dimension_numbers<[1], [0], [0], [1], [0, 0, 1, 1], [], []>} : vector<8x32xf32>, vector<32x512xf32>, vector<8x512xf32> -> vector<8x512xf32>
    %c0_9 = arith.constant 0 : index
    %c0_10 = arith.constant 0 : index
    %10 = vector.load %arg5[%c0_9, %c0_10] : memref<1x512xf32, #tpu.memory_space<vmem>>, vector<1x512xf32>
    %11 = vector.broadcast %10 : vector<1x512xf32> to vector<8x512xf32>
    %12 = arith.addf %9, %11 : vector<8x512xf32>
    %c0_11 = arith.constant 0 : index
    %c0_12 = arith.constant 0 : index
    %13 = vector.load %arg6[%c0_11, %c0_12] : memref<8x512xf32, #tpu.memory_space<vmem>>, vector<8x512xf32>
    tpu.vector_store %arg6[%c0_11, %c0_12], %12 {strides = array<i32>} : memref<8x512xf32, #tpu.memory_space<vmem>>, vector<8x512xf32>,
    return
  }
  func.func @transform_0(%arg0: i32) -> (i32, i32) {
    %c0_i32 = arith.constant 0 : i32
    %c0_i32_0 = arith.constant 0 : i32
    return %arg0, %c0_i32 : i32, i32
  }
  func.func @transform_1(%arg0: i32) -> (i32, i32) {
    %c0_i32 = arith.constant 0 : i32
    %c0_i32_0 = arith.constant 0 : i32
    %c0_i32_1 = arith.constant 0 : i32
    return %c0_i32, %c0_i32_0 : i32, i32
  }
  func.func @transform_2(%arg0: i32) -> (i32, i32) {
    %c0_i32 = arith.constant 0 : i32
    %c0_i32_0 = arith.constant 0 : i32
    %c0_i32_1 = arith.constant 0 : i32
    return %c0_i32, %c0_i32_0 : i32, i32
  }
  func.func @transform_3(%arg0: i32) -> (i32, i32) {
    %c0_i32 = arith.constant 0 : i32
    %c0_i32_0 = arith.constant 0 : i32
    %c0_i32_1 = arith.constant 0 : i32
    return %c0_i32, %c0_i32_0 : i32, i32
  }
  func.func @transform_4(%arg0: i32) -> (i32, i32) {
    %c0_i32 = arith.constant 0 : i32
    %c0_i32_0 = arith.constant 0 : i32
    %c0_i32_1 = arith.constant 0 : i32
    return %c0_i32, %c0_i32_0 : i32, i32
  }
  func.func @transform_5(%arg0: i32) -> (i32, i32) {
    %c0_i32 = arith.constant 0 : i32
    %c0_i32_0 = arith.constant 0 : i32
    return %arg0, %c0_i32 : i32, i32
  }
}

</mosaic_0001>

<bundles_post_ra>
// kernel: tpu_custom_call.1
= control target key start
LH: loop header
LB: loop body
LE: loop exit
PB: predicated region body
PF: predicated region fallthrough
CT: control target
= control target key end

     0   :  { %10 = vsyncpa [#allocation3], 0  ;;  %s1054_s0 = inlined_call_operand.vmem [shape: f32[16,512], index: 0, kind: input, shape index: {}]   ;;  %s1055_s1 = inlined_call_operand.vmem [shape: f32[512,32], index: 1, kind: input, shape index: {}]   ;;  %s1056_s2 = inlined_call_operand.vmem [shape: f32[1,32], index: 2, kind: input, shape index: {}]   ;;  %s1057_s3 = inlined_call_operand.vmem [shape: f32[32,512], index: 3, kind: input, shape index: {}]   ;;  %s1058_s4 = inlined_call_operand.vmem [shape: f32[1,512], index: 4, kind: input, shape index: {}]   ;;  %s1059_s5 = inlined_call_operand.hbm [shape: f32[16,512], index: 5, kind: output, shape index: {}]  }
   0x1   :  { %12 = vsyncpa [#allocation3 + $0x1], 0  ;;  %s718_s18 = smov 0   ;;  %s720_s19 = smov 0  }
   0x2   :  { %s722_s20 = smov 0   ;;  %s724_s21 = smov 0  }
   0x3 LB: > { %s739_s22 = sadd.s32 4294967295, %s686_s21   ;;  %s566_s23 = sadd.s32 4294967294, %s686_s21   ;;  %s686_s21 = sphi %s724_s21, %s1065_s21   ;;  %s682_s20 = sphi %s722_s20, %s1064_s20   ;;  %s678_s19 = sphi %s720_s19, %s1063_s19   ;;  %s674_s18 = sphi %s718_s18, %s1062_s18  }
   0x4   : > { %s743_s24 = sadd.s32 1, %s686_s21   ;;  %s135_s25 = sadd.s32 1, %s682_s20 }
   0x5   : > { %s132_s26 = ssub.s32 %s686_s21, %s743_s24  ;;  %p145_p0 = scmp.ne.s32.totalorder %s682_s20, %s678_s19 }
   0x6   : > { %p133_p1 = scmp.eq.s32.totalorder %s132_s26, 0  ;;  %p146_p2 = scmp.eq.s32.totalorder %s739_s22, 1 }
   0x7   : > { %p151_p3 = scmp.ne.s32.totalorder %s678_s19, %s674_s18  ;;  %p152_p4 = scmp.eq.s32.totalorder %s566_s23, 1 }
   0x8   : > { %s754_s27 = scalar_select %p133_p1, %s682_s20, %s135_s25  }
   0x9   : > { %p756_p5 = por %p146_p2, %p145_p0  ;;  %p760_p6 = por %p152_p4, %p151_p3 }
   0xa   : > { %p569_p7 = scmp.ge.s32.totalorder %s686_s21, 1  ;;  %p190_p8 = scmp.lt.s32.totalorder %s686_s21, 3 }
   0xc   : > { %p191_p9 = pnand %p569_p7, %p190_p8 }
   0xd   : > { %p218_p10 = scmp.lt.s32.totalorder (!%p191_p9), %s739_s22, 1  ;;  %s215_s12 = sand.u32 (!%p191_p9), 1, %s678_s19  }
   0xe   : > { %194 = sbr.rel (%p191_p9) target bundleno = 329 (0x149), region = 40  ;;  %s570_s23 = sshll.u32 (!%p191_p9), %s215_s12, 5 }
   0xf   : > { %s583_s25 = sshll.u32 (!%p191_p9), %s739_s22, 5  ;;  %s644_s11 = scalar_lea.hbm (!%p191_p9), %s1059_s5, 64 }
  0x10   : > { %s502_s6 = scalar_lea.hbm (!%p191_p9), %s1059_s5, %s583_s25 }
  0x13   : > { %v274_v0 = vld [vmem:[%s1055_s1 + $0x178] sm:$0xff]  ;;  %v273_v2 = vld [vmem:[%s1055_s1 + $0x170] sm:$0xff]  ;;  %v272_v6 = vld [vmem:[%s1055_s1 + $0x168] sm:$0xff]  ;;  %s902_s13 = scalar_select %p218_p10, %s739_s22, 1  ;;  %vm402_vm0 = vcmask 261120  }
  0x14   : > { %v242_v1 = vld [vmem:[%s1055_s1 + $0x78] sm:$0xff]  ;;  %335 = vmatpush.msra.mxu2 %v274_v0  ;;  %v241_v4 = vld [vmem:[%s1055_s1 + $0x70] sm:$0xff]  ;;  %v240_v8 = vld [vmem:[%s1055_s1 + $0x68] sm:$0xff]  ;;  %s491_s22 = scalar_lea.sflag [#allocation3], %s215_s12 }
  0x15   : > { %295 = vmatpush.msra.mxu0 %v242_v1  ;;  %v290_v3 = vld [vmem:[%s1055_s1 + $0x1f8] sm:$0xff]  ;;  %v289_v7 = vld [vmem:[%s1055_s1 + $0x1f0] sm:$0xff]  ;;  %v288_v10 = vld [vmem:[%s1055_s1 + $0x1e8] sm:$0xff]  ;;  %s582_s15 = sshll.u32 %s902_s13, 5 }
  0x16   : > { %v258_v5 = vld [vmem:[%s1055_s1 + $0xf8] sm:$0xff]  ;;  %355 = vmatpush.msra.mxu3 %v290_v3  ;;  %336 = vmatpush.msra.mxu2 %v273_v2  ;;  %v257_v9 = vld [vmem:[%s1055_s1 + $0xf0] sm:$0xff]  ;;  %v271_v11 = vld [vmem:[%s1055_s1 + $0x160] sm:$0xff]  ;;  %s222_s14 = scalar_lea.vmem %s1054_s0, %s582_s15  ;;  %s506_s15 = sshll.u32 %s502_s6, 4  ;;  %s507_s15 = int_to_ptr.hbm [resolvable:$true] %s506_s15 }
  0x17   : > { %315 = vmatpush.msra.mxu1 %v258_v5  ;;  %296 = vmatpush.msra.mxu0 %v241_v4  ;;  %v239_v12 = vld [vmem:[%s1055_s1 + $0x60] sm:$0xff]  ;;  %v256_v13 = vld [vmem:[%s1055_s1 + $0xe8] sm:$0xff]  ;;  %v270_v16 = vld [vmem:[%s1055_s1 + $0x158] sm:$0xff]  ;;  %s638_s13 = sshra.s32 %s507_s15, 4  ;;  %s639_s13 = int_to_ptr.hbm [resolvable:$true] %s638_s13 }
  0x18   : > { %356 = vmatpush.msra.mxu3 %v289_v7  ;;  %337 = vmatpush.msra.mxu2 %v272_v6  ;;  %v287_v14 = vld [vmem:[%s1055_s1 + $0x1e0] sm:$0xff]  ;;  %v238_v17 = vld [vmem:[%s1055_s1 + $0x58] sm:$0xff]  ;;  %v269_v20 = vld [vmem:[%s1055_s1 + $0x150] sm:$0xff]  ;;  %s640_s8 = scalar_lea.hbm %s639_s13, 32  ;;  %p645_p0 = scmp.lt.s32.totalorder %s639_s13, %s1059_s5 }
  0x19   : > { %316 = vmatpush.msra.mxu1 %v257_v9  ;;  %297 = vmatpush.msra.mxu0 %v240_v8  ;;  %v255_v15 = vld [vmem:[%s1055_s1 + $0xe0] sm:$0xff]  ;;  %v286_v18 = vld [vmem:[%s1055_s1 + $0x1d8] sm:$0xff]  ;;  %v237_v21 = vld [vmem:[%s1055_s1 + $0x50] sm:$0xff]  ;;  %p641_p11 = scmp.ne.s32.totalorder %s639_s13, %s640_s8  ;;  %p646_p1 = scmp.lt.s32.totalorder %s644_s11, %s640_s8 }
  0x1a   : > { %357 = vmatpush.msra.mxu3 %v288_v10  ;;  %338 = vmatpush.msra.mxu2 %v271_v11  ;;  %v254_v19 = vld [vmem:[%s1055_s1 + $0xd8] sm:$0xff]  ;;  %v285_v22 = vld [vmem:[%s1055_s1 + $0x1d0] sm:$0xff]  ;;  %v268_v24 = vld [vmem:[%s1055_s1 + $0x148] sm:$0xff] }
  0x1b   : > { %317 = vmatpush.msra.mxu1 %v256_v13  ;;  %298 = vmatpush.msra.mxu0 %v239_v12  ;;  %v253_v23 = vld [vmem:[%s1055_s1 + $0xd0] sm:$0xff]  ;;  %v236_v25 = vld [vmem:[%s1055_s1 + $0x48] sm:$0xff]  ;;  %v267_v28 = vld [vmem:[%s1055_s1 + $0x140] sm:$0xff]  ;;  %p642_p12 = pnand %p641_p11, %p756_p5  ;;  %p647_p2 = por %p646_p1, %p645_p0 }
  0x1c   : > { %358 = vmatpush.msra.mxu3 %v287_v14  ;;  %339 = vmatpush.msra.mxu2 %v270_v16  ;;  %v284_v26 = vld [vmem:[%s1055_s1 + $0x1c8] sm:$0xff]  ;;  %v235_v29 = vld [vmem:[%s1055_s1 + $0x40] sm:$0xff]  ;;  %v266_v32 = vld [vmem:[%s1055_s1 + $0x138] sm:$0xff] }
  0x1d   : > { %318 = vmatpush.msra.mxu1 %v255_v15  ;;  %299 = vmatpush.msra.mxu0 %v238_v17  ;;  %v252_v27 = vld [vmem:[%s1055_s1 + $0xc8] sm:$0xff]  ;;  %v283_v30 = vld [vmem:[%s1055_s1 + $0x1c0] sm:$0xff]  ;;  %v234_v33 = vld [vmem:[%s1055_s1 + $0x38] sm:$0xff]  ;;  %p643_p13 = pneg %p642_p12 }
  0x1e   : > { %359 = vmatpush.msra.mxu3 %v286_v18  ;;  %340 = vmatpush.msra.mxu2 %v269_v20  ;;  %v251_v31 = vld [vmem:[%s1055_s1 + $0xc0] sm:$0xff]  ;;  %v282_v34 = vld [vmem:[%s1055_s1 + $0x1b8] sm:$0xff]  ;;  %v265_v36 = vld [vmem:[%s1055_s1 + $0x130] sm:$0xff] }
  0x1f   : > { %319 = vmatpush.msra.mxu1 %v254_v19  ;;  %300 = vmatpush.msra.mxu0 %v237_v21  ;;  %v250_v35 = vld [vmem:[%s1055_s1 + $0xb8] sm:$0xff]  ;;  %v233_v37 = vld [vmem:[%s1055_s1 + $0x30] sm:$0xff]  ;;  %v264_v40 = vld [vmem:[%s1055_s1 + $0x128] sm:$0xff]  ;;  %p648_p3 = pnand %p647_p2, %p643_p13 }
  0x20   : > { %360 = vmatpush.msra.mxu3 %v285_v22  ;;  %341 = vmatpush.msra.mxu2 %v268_v24  ;;  %v281_v38 = vld [vmem:[%s1055_s1 + $0x1b0] sm:$0xff]  ;;  %v232_v41 = vld [vmem:[%s1055_s1 + $0x28] sm:$0xff]  ;;  %v263_v44 = vld [vmem:[%s1055_s1 + $0x120] sm:$0xff] }
  0x21   : > { %320 = vmatpush.msra.mxu1 %v253_v23  ;;  %301 = vmatpush.msra.mxu0 %v236_v25  ;;  %v249_v39 = vld [vmem:[%s1055_s1 + $0xb0] sm:$0xff]  ;;  %v280_v42 = vld [vmem:[%s1055_s1 + $0x1a8] sm:$0xff]  ;;  %v231_v45 = vld [vmem:[%s1055_s1 + $0x20] sm:$0xff] }
  0x22   : > { %361 = vmatpush.msra.mxu3 %v284_v26  ;;  %342 = vmatpush.msra.mxu2 %v267_v28  ;;  %v248_v43 = vld [vmem:[%s1055_s1 + $0xa8] sm:$0xff]  ;;  %v279_v46 = vld [vmem:[%s1055_s1 + $0x1a0] sm:$0xff]  ;;  %v262_v48 = vld [vmem:[%s1055_s1 + $0x118] sm:$0xff] }
  0x23   : > { %321 = vmatpush.msra.mxu1 %v252_v27  ;;  %302 = vmatpush.msra.mxu0 %v235_v29  ;;  %v247_v47 = vld [vmem:[%s1055_s1 + $0xa0] sm:$0xff]  ;;  %v230_v49 = vld [vmem:[%s1055_s1 + $0x18] sm:$0xff]  ;;  %v261_v52 = vld [vmem:[%s1055_s1 + $0x110] sm:$0xff] }
  0x24   : > { %362 = vmatpush.msra.mxu3 %v283_v30  ;;  %343 = vmatpush.msra.mxu2 %v266_v32  ;;  %v278_v50 = vld [vmem:[%s1055_s1 + $0x198] sm:$0xff]  ;;  %v229_v53 = vld [vmem:[%s1055_s1 + $0x10] sm:$0xff]  ;;  %v260_v56 = vld [vmem:[%s1055_s1 + $0x108] sm:$0xff] }
  0x25   : > { %322 = vmatpush.msra.mxu1 %v251_v31  ;;  %303 = vmatpush.msra.mxu0 %v234_v33  ;;  %v246_v51 = vld [vmem:[%s1055_s1 + $0x98] sm:$0xff]  ;;  %v277_v54 = vld [vmem:[%s1055_s1 + $0x190] sm:$0xff]  ;;  %v228_v57 = vld [vmem:[%s1055_s1 + $0x8] sm:$0xff] }
  0x26   : > { %363 = vmatpush.msra.mxu3 %v282_v34  ;;  %344 = vmatpush.msra.mxu2 %v265_v36  ;;  %v245_v55 = vld [vmem:[%s1055_s1 + $0x90] sm:$0xff]  ;;  %v276_v58 = vld [vmem:[%s1055_s1 + $0x188] sm:$0xff]  ;;  %v259_v60 = vld [vmem:[%s1055_s1 + $0x100] sm:$0xff] }
  0x27   : > { %323 = vmatpush.msra.mxu1 %v250_v35  ;;  %304 = vmatpush.msra.mxu0 %v233_v37  ;;  %v244_v59 = vld [vmem:[%s1055_s1 + $0x88] sm:$0xff]  ;;  %v227_v61 = vld [vmem:[%s1055_s1] sm:$0xff]  ;;  %v225_v62 = vld [vmem:[%s222_s14 + $0x10] sm:$0xff] }
  0x28   : > { %364 = vmatpush.msra.mxu3 %v281_v38  ;;  %345 = vmatpush.msra.mxu2 %v264_v40  ;;  %v275_v63 = vld [vmem:[%s1055_s1 + $0x180] sm:$0xff]  ;;  %v226_v1 = vld [vmem:[%s222_s14 + $0x18] sm:$0xff]  ;;  %v224_v3 = vld [vmem:[%s222_s14 + $0x8] sm:$0xff] }
  0x29   : > { %324 = vmatpush.msra.mxu1 %v249_v39  ;;  %305 = vmatpush.msra.mxu0 %v232_v41  ;;  %v223_v0 = vld [vmem:[%s222_s14] sm:$0xff]  ;;  %v390_v4 = vld [vmem:[%s1057_s3 + $0x70] sm:$0xff]  ;;  %v391_v5 = vld [vmem:[%s1057_s3 + $0x78] sm:$0xff]  ;;  %s217_s14 = scalar_lea.vmem [#allocation2], %s570_s23 }
  0x2a   : > { %365 = vmatpush.msra.mxu3 %v280_v42  ;;  %346 = vmatpush.msra.mxu2 %v263_v44  ;;  %v243_v2 = vld [vmem:[%s1055_s1 + $0x80] sm:$0xff]  ;;  %v389_v7 = vld [vmem:[%s1057_s3 + $0x68] sm:$0xff]  ;;  %v386_v8 = vld [vmem:[%s1057_s3 + $0x50] sm:$0xff]  ;;  %s504_s7 = sshll.u32 %s217_s14, 4  ;;  %s505_s7 = int_to_ptr.vmem [resolvable:$true] %s504_s7 }
  0x2b   : > { %325 = vmatpush.msra.mxu1 %v248_v43  ;;  %306 = vmatpush.msra.mxu0 %v231_v45  ;;  %v388_v6 = vld [vmem:[%s1057_s3 + $0x60] sm:$0xff]  ;;  %v387_v9 = vld [vmem:[%s1057_s3 + $0x58] sm:$0xff]  ;;  %v385_v11 = vld [vmem:[%s1057_s3 + $0x48] sm:$0xff] }
  0x2c   : > { %366 = vmatpush.msra.mxu3 %v279_v46  ;;  %347 = vmatpush.msra.mxu2 %v262_v48  ;;  %v384_v10 = vld [vmem:[%s1057_s3 + $0x40] sm:$0xff]  ;;  %v382_v12 = vld [vmem:[%s1057_s3 + $0x30] sm:$0xff]  ;;  %v383_v13 = vld [vmem:[%s1057_s3 + $0x38] sm:$0xff] }
  0x2d   : > { %326 = vmatpush.msra.mxu1 %v247_v47  ;;  %307 = vmatpush.msra.mxu0 %v230_v49  ;;  %v380_v14 = vld [vmem:[%s1057_s3 + $0x20] sm:$0xff]  ;;  %v381_v15 = vld [vmem:[%s1057_s3 + $0x28] sm:$0xff]  ;;  %v378_v16 = vld [vmem:[%s1057_s3 + $0x10] sm:$0xff] }
  0x2e   : > { %367 = vmatpush.msra.mxu3 %v278_v50  ;;  %348 = vmatpush.msra.mxu2 %v261_v52  ;;  %v379_v17 = vld [vmem:[%s1057_s3 + $0x18] sm:$0xff]  ;;  %v376_v18 = vld [vmem:[%s1057_s3] sm:$0xff]  ;;  %v377_v19 = vld [vmem:[%s1057_s3 + $0x8] sm:$0xff] }
  0x2f   : > { %327 = vmatpush.msra.mxu1 %v246_v51  ;;  %308 = vmatpush.msra.mxu0 %v229_v53  ;;  %v623_v20 = vld [vmem:[%s1056_s2] ss:$0 sm:$0xff] }
  0x30   : > { %368 = vmatpush.msra.mxu3 %v277_v54  ;;  %349 = vmatpush.msra.mxu2 %v260_v56  ;;  %v392_v30 = vld [vmem:[%s1058_s4] sm:$0xf] }
  0x31   : > { %328 = vmatpush.msra.mxu1 %v245_v55  ;;  %309 = vmatpush.msra.mxu0 %v228_v57  ;;  %v394_v31 = vperm.slane %v392_v30, 0  ;;  %v395_v32 = vperm.slane %v392_v30, 1  ;;  %v396_v37 = vperm.slane %v392_v30, 2  ;;  %v397_v38 = vperm.slane %v392_v30, 3 }
  0x32   : > { %369 = vmatpush.msra.mxu3 %v276_v58  ;;  %350 = vmatpush.msra.mxu2 %v259_v60 }
  0x33   : > { %329 = vmatpush.msra.mxu1 %v244_v59  ;;  %310 = vmatpush.msra.mxu0 %v227_v61 }
  0x34   : > { %351 = vmatmul.f32.vlgmr.msra.gmra.mxu2 %v225_v62  ;;  %370 = vmatpush.msra.mxu3 %v275_v63 }
  0x35   : > { %311 = vmatmul.f32.vlgmr.msra.gmra.mxu0 %v223_v0  ;;  %371 = vmatmul.f32.vlgmr.msra.gmra.mxu3 %v226_v1 }
  0x36   : > { %330 = vmatpush.msra.mxu1 %v243_v2  ;;  %458 = vmatpush.msrb.mxu2 %v390_v4 }
  0x37   : > { %331 = vmatmul.f32.vlgmr.msra.gmra.mxu1 %v224_v3  ;;  %478 = vmatpush.msrb.mxu3 %v391_v5 }
  0x38   : > { %418 = vmatpush.msrb.mxu0 %v388_v6  ;;  %438 = vmatpush.msrb.mxu1 %v389_v7 }
  0x39   : > { %459 = vmatpush.msrb.mxu2 %v386_v8  ;;  %479 = vmatpush.msrb.mxu3 %v387_v9 }
  0x3a   : > { %419 = vmatpush.msrb.mxu0 %v384_v10  ;;  %439 = vmatpush.msrb.mxu1 %v385_v11 }
  0x3b   : > { %460 = vmatpush.msrb.mxu2 %v382_v12  ;;  %480 = vmatpush.msrb.mxu3 %v383_v13 }
  0x3c   : > { %420 = vmatpush.msrb.mxu0 %v380_v14  ;;  %440 = vmatpush.msrb.mxu1 %v381_v15 }
  0x3d   : > { %461 = vmatpush.msrb.mxu2 %v378_v16  ;;  %481 = vmatpush.msrb.mxu3 %v379_v17 }
  0x3e   : > { %421 = vmatpush.msrb.mxu0 %v376_v18  ;;  %441 = vmatpush.msrb.mxu1 %v377_v19 }
  0xb2   : > { %v312_v21 = vpop.f32.mrf.mxu0 }
  0xb3   : > { %v313_v22 = vadd.f32 %v623_v20, %v312_v21 }
  0xb4   : > { %v332_v23 = vpop.f32.mrf.mxu1 }
  0xb5   : > { %v333_v24 = vadd.f32 %v332_v23, %v313_v22 }
  0xb7   : > { %v352_v25 = vpop.f32.mrf.mxu2 }
  0xb8   : > { %v353_v26 = vadd.f32 %v352_v25, %v333_v24  ;;  %v372_v27 = vpop.f32.mrf.mxu3 }
  0xba   : > { %v373_v28 = vadd.f32 %v372_v27, %v353_v26 }
  0xbc   : > { %v375_v29 = vmax.f32 %v373_v28, 0.0 }
  0xbe   : > { %573 = vmatmul.msk.f32.vlgmr.msrb.gmra.mxu0 %vm402_vm0, %v375_v29  ;;  %574 = vmatmul.msk.f32.vlgmr.msrb.gmra.mxu1 %vm402_vm0, %v375_v29 }
  0xbf   : > { %575 = vmatmul.msk.f32.vlgmr.msrb.gmra.mxu2 %vm402_vm0, %v375_v29  ;;  %576 = vmatmul.msk.f32.vlgmr.msrb.gmra.mxu3 %vm402_vm0, %v375_v29 }
 0x13b   : > { %v423_v33 = vpop.f32.mrf.mxu0  ;;  %v443_v34 = vpop.f32.mrf.mxu1 }
 0x13c   : > { %v424_v35 = vadd.f32 %v423_v33, %v394_v31  ;;  %v444_v36 = vadd.f32 %v443_v34, %v395_v32 }
 0x13e   : > { %486 = vst [vmem:[%s217_s14] sm:$0xff] %v424_v35 }
 0x13f   : > { %487 = vst [vmem:[%s217_s14 + $0x8] sm:$0xff] %v444_v36 }
 0x142   : > { %v463_v39 = vpop.f32.mrf.mxu2  ;;  %v483_v40 = vpop.f32.mrf.mxu3 }
 0x143   : > { %v464_v41 = vadd.f32 %v463_v39, %v396_v37  ;;  %v484_v42 = vadd.f32 %v483_v40, %v397_v38 }
 0x145   : > { %488 = vst [vmem:[%s217_s14 + $0x10] sm:$0xff] %v464_v41 }
 0x146   : > { %489 = vst [vmem:[%s217_s14 + $0x18] sm:$0xff] %v484_v42 }
 0x147   : > { %651 = shalt.err (!%p648_p3)
}
 0x148   : > { %584 = dma.vmem_to_hbm [thread:$0]  (%p756_p5), %s505_s7, 512, %s507_s15, %s491_s22  }
 0x149 PF: > { %p590_p4 = scmp.ge.s32.totalorder %s686_s21, 2  ;;  %s518_s12 = sand.u32 1, %s674_s18  }
 0x14a   : > { %s519_s23 = scalar_lea.sflag [#allocation3], %s518_s12 }
 0x14b   : > { %p587_p7 = pnand %p590_p4, %p760_p6 }
 0x14d   : > { %p588_p8 = pneg %p587_p7 }
 0x14f   : > { %669 = dma.done.wait (%p588_p8), %s519_s23, 512  }
 0x150   : > { %671 = vsyncadd (%p588_p8), %s519_s23, 4294966784  ;;  %p15_p9 = scmp.ge.s32.totalorder %s743_s24, 4   ;;  %s1062_s18 = smov %s678_s19 }
 0x151   : > { %s1063_s19 = smov %s682_s20  ;;  %s1064_s20 = smov %s754_s27 }
 0x152   : > { %s1065_s21 = smov %s743_s24  ;;  %17 = sbr.rel (!%p15_p9) target bundleno = 3 (0x3), region = 75 }
 0x157   :  { %525 = vsyncpa [#allocation3], 1 }
 0x158   :  { %527 = vsyncpa [#allocation3 + $0x1], 1 }

</bundles_post_ra>
